<compile_context>
chip_gen: v7x
topology: tpu7x:2x2x1
jax: 0.10.0
libtpu: 0.0.40
codegen_flags: <defaults>
</compile_context>

<pallas_src>
import functools

import jax
import jax.numpy as jnp
from jax.experimental import pallas as pl
from jax.experimental.pallas import tpu as pltpu


def _round_up(v, m):
    return ((v + m - 1) // m) * m


def _gcn_first_order_kernel(xs_ref, w1_ref, w2_ref, dadt_ref, o_ref, *, t):
    """One (n, k) grid step.

    xs_ref / w1_ref / w2_ref : (B, n_pad) f32, fully VMEM-resident (constant index_map).
    dadt_ref                 : (t, t) tile of DAD^T in the streaming dtype, block (k, n).
    o_ref                    : (B, t) f32 output tile for node block n; resident across k
                               and doubles as the accumulator.
    """
    n = pl.program_id(0)
    k = pl.program_id(1)
    nk = pl.num_programs(1)

    # Contraction slice of xs (columns j in [k*t, (k+1)*t)); cast so the MXU sees a
    # homogeneous matmul (bf16 x bf16 or f32 x f32), always accumulated in f32.
    k_off = pl.multiple_of(k * t, t)
    xs_k = xs_ref[:, pl.ds(k_off, t)].astype(dadt_ref.dtype)

    # Canonical [B, K] x [K, N] contraction; DAD^T was precomputed once in the wrapper so
    # no per-tile transpose / relayout is needed.
    part = jnp.dot(xs_k, dadt_ref[...], preferred_element_type=jnp.float32)

    @pl.when(k == 0)
    def _():
        o_ref[...] = part

    @pl.when(k > 0)
    def _():
        o_ref[...] += part

    @pl.when(k == nk - 1)
    def _():
        n_off = pl.multiple_of(n * t, t)
        xs_n = xs_ref[:, pl.ds(n_off, t)]               # f32 copy for the element-wise term
        o_ref[...] = (xs_n * w1_ref[:, pl.ds(n_off, t)]
                      + o_ref[...] * w2_ref[:, pl.ds(n_off, t)])


def make_gcn_first_order(dad, *, tile=1024, stream_dtype=jnp.bfloat16):
    """Build a forward(x, w1, w2) closure for a fixed normalized adjacency `dad` (N, N).

    The expensive one-time work (transpose -> canonical MXU contraction, cast to the
    streaming dtype, zero-pad to the tile grid) is hoisted here so repeated forward calls
    only stream the prepared DAD^T.
    """
    dad = jnp.asarray(dad, jnp.float32)
    N = dad.shape[0]
    assert dad.shape == (N, N)

    # Lane-dense tile: multiple of 128, capped by `tile`; collapses to a single tile when
    # N fits (small-N fast path).
    t = min(_round_up(N, 128), _round_up(int(tile), 128))
    n_pad = _round_up(N, t)

    dad_t = dad.T.astype(stream_dtype)                  # DAD^T: kernel does xs @ DAD^T
    if n_pad != N:
        p = n_pad - N
        dad_t = jnp.pad(dad_t, ((0, p), (0, p)))

    stream_bytes = jnp.dtype(stream_dtype).itemsize
    grid = (n_pad // t, n_pad // t)                     # (n output tiles, k reduction tiles)
    kernel = functools.partial(_gcn_first_order_kernel, t=t)

    def forward(x, w1, w2):
        xs = jnp.squeeze(x, axis=1).astype(jnp.float32)  # glue: squeeze(1) -> (B, N)
        B = xs.shape[0]
        assert xs.shape == (B, N)
        assert w1.shape == (B, N) and w2.shape == (B, N)
        w1f = jnp.asarray(w1, jnp.float32)
        w2f = jnp.asarray(w2, jnp.float32)
        if n_pad != N:
            p = n_pad - N
            xs = jnp.pad(xs, ((0, 0), (0, p)))
            w1f = jnp.pad(w1f, ((0, 0), (0, p)))
            w2f = jnp.pad(w2f, ((0, 0), (0, p)))

        # VMEM budget: double-buffered DAD^T tile + resident xs/W1/W2 + output tile.
        vmem_need = (2 * t * t * stream_bytes
                     + 2 * 3 * B * n_pad * 4
                     + 2 * B * t * 4)
        vmem_limit = min(max(int(1.25 * vmem_need) + (4 << 20), 32 << 20), 100 << 20)

        out = pl.pallas_call(
            kernel,
            out_shape=jax.ShapeDtypeStruct((B, n_pad), jnp.float32),
            grid_spec=pltpu.PrefetchScalarGridSpec(
                num_scalar_prefetch=0,
                grid=grid,
                in_specs=[
                    pl.BlockSpec((B, n_pad), lambda n, k: (0, 0)),  # xs (resident, f32)
                    pl.BlockSpec((B, n_pad), lambda n, k: (0, 0)),  # W1 (resident, f32)
                    pl.BlockSpec((B, n_pad), lambda n, k: (0, 0)),  # W2 (resident, f32)
                    pl.BlockSpec((t, t), lambda n, k: (k, n)),      # DAD^T tile (HBM stream)
                ],
                out_specs=pl.BlockSpec((B, t), lambda n, k: (0, n)),
            ),
            compiler_params=pltpu.CompilerParams(
                # n tiles are independent -> shard across TensorCores; k is the reduction
                # axis (resident output/accumulator) -> arbitrary, innermost.
                dimension_semantics=("parallel", "arbitrary"),
                vmem_limit_bytes=vmem_limit,
            ),
            cost_estimate=pl.CostEstimate(
                flops=2 * B * n_pad * n_pad,
                transcendentals=0,
                bytes_accessed=(n_pad * n_pad * stream_bytes + 4 * B * n_pad * 4),
            ),
        )(xs, w1f, w2f, dad_t)

        return out[:, :N] if n_pad != N else out

    return forward


def gcn_layer_first_order(x, dad, w1, w2, *, tile=1024, stream_dtype=jnp.bfloat16):
    """One-shot convenience wrapper; for repeated calls prefer make_gcn_first_order(dad)."""
    return make_gcn_first_order(dad, tile=tile, stream_dtype=stream_dtype)(x, w1, w2)


if __name__ == "__main__":
    # Small shapes consistent with the module's broadcasting:
    #   in_features = B = 8, out_features = N = 256 (nodes), x has a singleton dim 1.
    B, N = 8, 256
    key = jax.random.PRNGKey(0)
    kx, kd, kw1, kw2 = jax.random.split(key, 4)

    x = jax.random.normal(kx, (B, 1, N), dtype=jnp.float32)
    # deterministic synthetic normalized adjacency (stand-in for D^-1/2 A D^-1/2)
    a = jax.random.uniform(kd, (N, N), dtype=jnp.float32)
    a = (a + a.T) * 0.5 + jnp.eye(N, dtype=jnp.float32)
    deg = jnp.sum(a, axis=1)
    dinv = 1.0 / jnp.sqrt(deg)
    DAD = dinv[:, None] * a * dinv[None, :]
    # deterministic stand-ins for np.random.normal(0,1,(in_features,out_features))
    W1 = jax.random.normal(kw1, (B, N), dtype=jnp.float32)
    W2 = jax.random.normal(kw2, (B, N), dtype=jnp.float32)

    xs = jnp.squeeze(x, axis=1)
    ref = xs * W1 + jnp.einsum("ij,bj->bi", DAD, xs) * W2

    # 1) exact f32 stream, small tile to exercise the (n, k) grid + accumulator path: grid (2,2)
    forward_f32 = make_gcn_first_order(DAD, tile=128, stream_dtype=jnp.float32)
    out = forward_f32(x, W1, W2)
    jax.block_until_ready(out)
    assert out.shape == (B, N)
    assert jnp.allclose(out, ref, atol=1e-4, rtol=1e-4)

    # 2) small-N fast path: single tile, grid collapses to (1, 1)
    out_1t = gcn_layer_first_order(x, DAD, W1, W2, tile=1024, stream_dtype=jnp.float32)
    jax.block_until_ready(out_1t)
    assert jnp.allclose(out_1t, ref, atol=1e-4, rtol=1e-4)

    # 3) padding path: N not a multiple of the 128-lane tile
    Np = 200
    out_p = gcn_layer_first_order(
        x[:, :, :Np], DAD[:Np, :Np], W1[:, :Np], W2[:, :Np],
        tile=128, stream_dtype=jnp.float32,
    )
    jax.block_until_ready(out_p)
    ref_p = xs[:, :Np] * W1[:, :Np] + jnp.einsum(
        "ij,bj->bi", DAD[:Np, :Np], xs[:, :Np]
    ) * W2[:, :Np]
    assert jnp.allclose(out_p, ref_p, atol=1e-4, rtol=1e-4)

    # 4) default bf16-streamed DAD (halves HBM traffic for the dominant operand; f32 accumulate)
    out_bf16 = gcn_layer_first_order(x, DAD, W1, W2, tile=128)
    jax.block_until_ready(out_bf16)
    assert float(jnp.max(jnp.abs(out_bf16 - ref))) < 1e-1

    print("KERNEL_OK")
</pallas_src>

<mosaic_0001>
module attributes {stable_mosaic.version = 11 : i64} {
  func.func @_gcn_first_order_kernel(%arg0: i32, %arg1: i32, %arg2: memref<8x256xf32, #tpu.memory_space<vmem>>, %arg3: memref<8x256xf32, #tpu.memory_space<vmem>>, %arg4: memref<8x256xf32, #tpu.memory_space<vmem>>, %arg5: memref<128x128xf32, #tpu.memory_space<vmem>>, %arg6: memref<8x128xf32, #tpu.memory_space<vmem>>) attributes {dimension_semantics = [#tpu.dimension_semantics<parallel>, #tpu.dimension_semantics<arbitrary>], iteration_bounds = array<i64: 2, 2>, scalar_prefetch = 0 : i64, scratch_operands = 0 : i64, tpu.core_type = #tpu.core_type<tc>, window_params = [{pipeline_mode = #tpu.pipeline_mode<synchronous>, transform_indices = @transform_0, window_bounds = array<i64: 8, 256>}, {pipeline_mode = #tpu.pipeline_mode<synchronous>, transform_indices = @transform_1, window_bounds = array<i64: 8, 256>}, {pipeline_mode = #tpu.pipeline_mode<synchronous>, transform_indices = @transform_2, window_bounds = array<i64: 8, 256>}, {transform_indices = @transform_3, window_bounds = array<i64: 128, 128>}, {transform_indices = @transform_4, window_bounds = array<i64: 8, 128>}]} {
    %c128_i32 = arith.constant 128 : i32
    %0 = arith.muli %arg1, %c128_i32 : i32
    %1 = tpu.assume_multiple %0, 128 : i32
    %c0 = arith.constant 0 : index
    %2 = arith.index_cast %1 : i32 to index
    %3 = vector.load %arg2[%c0, %2] : memref<8x256xf32, #tpu.memory_space<vmem>>, vector<8x128xf32>
    %c0_0 = arith.constant 0 : index
    %c0_1 = arith.constant 0 : index
    %4 = vector.load %arg5[%c0_0, %c0_1] : memref<128x128xf32, #tpu.memory_space<vmem>>, vector<128x128xf32>
    %cst = arith.constant dense<0.000000e+00> : vector<8x128xf32>
    %5 = tpu.matmul %3, %4, %cst {dimension_numbers = #tpu.dot_dimension_numbers<[1], [0], [0], [1], [0, 0, 1, 1], [], []>} : vector<8x128xf32>, vector<128x128xf32>, vector<8x128xf32> -> vector<8x128xf32>
    %c0_i32 = arith.constant 0 : i32
    %6 = arith.cmpi eq, %arg1, %c0_i32 : i32
    %7 = arith.extui %6 : i1 to i32
    %c0_i32_2 = arith.constant 0 : i32
    %8 = arith.cmpi ne, %7, %c0_i32_2 : i32
    scf.if %8 {
      %c0_6 = arith.constant 0 : index
      %c0_7 = arith.constant 0 : index
      %15 = vector.load %arg6[%c0_6, %c0_7] : memref<8x128xf32, #tpu.memory_space<vmem>>, vector<8x128xf32>
      tpu.vector_store %arg6[%c0_6, %c0_7], %5 {strides = array<i32>} : memref<8x128xf32, #tpu.memory_space<vmem>>, vector<8x128xf32>,
    } else {
    }
    %c0_i32_3 = arith.constant 0 : i32
    %9 = arith.cmpi sgt, %arg1, %c0_i32_3 : i32
    %10 = arith.extui %9 : i1 to i32
    %c0_i32_4 = arith.constant 0 : i32
    %11 = arith.cmpi ne, %10, %c0_i32_4 : i32
    scf.if %11 {
      %c0_6 = arith.constant 0 : index
      %c0_7 = arith.constant 0 : index
      %15 = vector.load %arg6[%c0_6, %c0_7] : memref<8x128xf32, #tpu.memory_space<vmem>>, vector<8x128xf32>
      %16 = arith.addf %15, %5 : vector<8x128xf32>
      %c0_8 = arith.constant 0 : index
      %c0_9 = arith.constant 0 : index
      %17 = vector.load %arg6[%c0_8, %c0_9] : memref<8x128xf32, #tpu.memory_space<vmem>>, vector<8x128xf32>
      tpu.vector_store %arg6[%c0_8, %c0_9], %16 {strides = array<i32>} : memref<8x128xf32, #tpu.memory_space<vmem>>, vector<8x128xf32>,
    } else {
    }
    %c1_i32 = arith.constant 1 : i32
    %12 = arith.cmpi eq, %arg1, %c1_i32 : i32
    %13 = arith.extui %12 : i1 to i32
    %c0_i32_5 = arith.constant 0 : i32
    %14 = arith.cmpi ne, %13, %c0_i32_5 : i32
    scf.if %14 {
      %c128_i32_6 = arith.constant 128 : i32
      %15 = arith.muli %arg0, %c128_i32_6 : i32
      %16 = tpu.assume_multiple %15, 128 : i32
      %c0_7 = arith.constant 0 : index
      %17 = arith.index_cast %16 : i32 to index
      %18 = vector.load %arg2[%c0_7, %17] : memref<8x256xf32, #tpu.memory_space<vmem>>, vector<8x128xf32>
      %c0_8 = arith.constant 0 : index
      %19 = arith.index_cast %16 : i32 to index
      %20 = vector.load %arg3[%c0_8, %19] : memref<8x256xf32, #tpu.memory_space<vmem>>, vector<8x128xf32>
      %21 = arith.mulf %18, %20 : vector<8x128xf32>
      %c0_9 = arith.constant 0 : index
      %c0_10 = arith.constant 0 : index
      %22 = vector.load %arg6[%c0_9, %c0_10] : memref<8x128xf32, #tpu.memory_space<vmem>>, vector<8x128xf32>
      %c0_11 = arith.constant 0 : index
      %23 = arith.index_cast %16 : i32 to index
      %24 = vector.load %arg4[%c0_11, %23] : memref<8x256xf32, #tpu.memory_space<vmem>>, vector<8x128xf32>
      %25 = arith.mulf %22, %24 : vector<8x128xf32>
      %26 = arith.addf %21, %25 : vector<8x128xf32>
      %c0_12 = arith.constant 0 : index
      %c0_13 = arith.constant 0 : index
      %27 = vector.load %arg6[%c0_12, %c0_13] : memref<8x128xf32, #tpu.memory_space<vmem>>, vector<8x128xf32>
      tpu.vector_store %arg6[%c0_12, %c0_13], %26 {strides = array<i32>} : memref<8x128xf32, #tpu.memory_space<vmem>>, vector<8x128xf32>,
    } else {
    }
    return
  }
  func.func @transform_0(%arg0: i32, %arg1: i32) -> (i32, i32) {
    %c0_i32 = arith.constant 0 : i32
    %c0_i32_0 = arith.constant 0 : i32
    %c0_i32_1 = arith.constant 0 : i32
    return %c0_i32, %c0_i32_0 : i32, i32
  }
  func.func @transform_1(%arg0: i32, %arg1: i32) -> (i32, i32) {
    %c0_i32 = arith.constant 0 : i32
    %c0_i32_0 = arith.constant 0 : i32
    %c0_i32_1 = arith.constant 0 : i32
    return %c0_i32, %c0_i32_0 : i32, i32
  }
  func.func @transform_2(%arg0: i32, %arg1: i32) -> (i32, i32) {
    %c0_i32 = arith.constant 0 : i32
    %c0_i32_0 = arith.constant 0 : i32
    %c0_i32_1 = arith.constant 0 : i32
    return %c0_i32, %c0_i32_0 : i32, i32
  }
  func.func @transform_3(%arg0: i32, %arg1: i32) -> (i32, i32) {
    %c0_i32 = arith.constant 0 : i32
    return %arg1, %arg0 : i32, i32
  }
  func.func @transform_4(%arg0: i32, %arg1: i32) -> (i32, i32) {
    %c0_i32 = arith.constant 0 : i32
    %c0_i32_0 = arith.constant 0 : i32
    return %c0_i32, %arg0 : i32, i32
  }
}

</mosaic_0001>

<bundles_post_ra>
// kernel: tpu_custom_call.1
= control target key start
LH: loop header
LB: loop body
LE: loop exit
PB: predicated region body
PF: predicated region fallthrough
CT: control target
= control target key end

     0   :  { %s1408_s0 = inlined_call_operand.hbm [shape: f32[8,256], index: 0, kind: input, shape index: {}]   ;;  %s1409_s1 = inlined_call_operand.hbm [shape: f32[8,256], index: 1, kind: input, shape index: {}]   ;;  %s1410_s2 = inlined_call_operand.hbm [shape: f32[8,256], index: 2, kind: input, shape index: {}]   ;;  %s1411_s3 = inlined_call_operand.hbm [shape: f32[256,256], index: 3, kind: input, shape index: {}]   ;;  %s1412_s4 = inlined_call_operand.hbm [shape: f32[8,256], index: 4, kind: output, shape index: {}]  }
   0x1   :  { %1424 = sst [smem:[#allocation18_spill]] %s1408_s0 }
   0x2   :  { %1425 = sst [smem:[#allocation19_spill]] %s1409_s1 }
   0x3   :  { %1426 = sst [smem:[#allocation20_spill]] %s1410_s2 }
   0x4   :  { %1427 = sst [smem:[#allocation21_spill]] %s1412_s4 }
   0x5   :  { %9 = vsyncpa [#allocation3], 0 }
   0x6   :  { %10 = vsyncpa [#allocation6], 0 }
   0x7   :  { %11 = vsyncpa [#allocation9], 0 }
   0x8   :  { %13 = vsyncpa [#allocation9 + $0x1], 0 }
   0x9   :  { %14 = vsyncpa [#allocation4], 0 }
   0xa   :  { %16 = vsyncpa [#allocation4 + $0x1], 0  ;;  %s1060_s15 = smov 0   ;;  %s1062_s16 = smov 0  }
   0xb   :  { %s1064_s17 = smov 0   ;;  %s1066_s18 = smov 0  }
   0xc   :  { %s1068_s19 = smov 0   ;;  %s1070_s20 = smov 0  }
   0xd   :  { %s1072_s21 = smov 0   ;;  %s1074_s22 = smov 0  }
   0xe   :  { %s1076_s23 = smov 0   ;;  %s1078_s24 = smov 0  }
   0xf   :  { %s1080_s25 = smov 0  }
  0x10 LB: > { %1428 = sst [smem:[#allocation15_spill]] %s982_s15  ;;  %s532_s26 = sadd.s32 4294967295, %s1022_s25   ;;  %s1022_s25 = sphi %s1080_s25, %s22_s25   ;;  %s1018_s24 = sphi %s1078_s24, %s1465_s24   ;;  %s1014_s23 = sphi %s1076_s23, %s1464_s23   ;;  %s1010_s22 = sphi %s1074_s22, %s1463_s22   ;;  %s1006_s21 = sphi %s1072_s21, %s1462_s21   ;;  %s1002_s20 = sphi %s1070_s20, %s1461_s20   ;;  %s998_s19 = sphi %s1068_s19, %s1460_s19   ;;  %s994_s18 = sphi %s1066_s18, %s1459_s18   ;;  %s990_s17 = sphi %s1064_s17, %s1458_s17   ;;  %s986_s16 = sphi %s1062_s16, %s1457_s16   ;;  %s982_s15 = sphi %s1060_s15, %s1456_s15  }
  0x11   : > { %1429 = sst [smem:[#allocation16_spill]] %s1022_s25  ;;  %s533_s27 = sadd.s32 4294967294, %s1022_s25  }
  0x12   : > { %p113_p0 = scmp.ne.s32.totalorder %s1002_s20, %s998_s19  ;;  %p114_p1 = scmp.eq.s32.totalorder %s1022_s25, 0 }
  0x13   : > { %p119_p2 = scmp.ne.s32.totalorder %s998_s19, %s994_s18  ;;  %p1120_p3 = scmp.eq.s32.totalorder %s532_s26, 0 }
  0x14   : > { %p1125_p4 = por %p114_p1, %p113_p0  ;;  %p142_p5 = scmp.ne.s32.totalorder %s990_s17, %s986_s16 }
  0x15   : > { %s1430_s29 = scalar_select %p1120_p3, 1, 0 }
  0x16   : > { %p1133_p6 = por %p1120_p3, %p119_p2  ;;  %p143_p7 = scmp.eq.s32.totalorder %s532_s26, 3 }
  0x17   : > { %p148_p8 = scmp.ne.s32.totalorder %s986_s16, %s982_s15  ;;  %p149_p9 = scmp.eq.s32.totalorder %s533_s27, 3 }
  0x18   : > { %s1432_s6 = scalar_select %p1133_p6, 1, 0 }
  0x19   : > { %p1139_p10 = por %p143_p7, %p142_p5  ;;  %p534_p11 = scmp.ge.s32.totalorder %s1022_s25, 1 }
  0x1a   : > { %p1144_p12 = por %p149_p9, %p148_p8  ;;  %p156_p13 = scmp.lt.s32.totalorder %s1022_s25, 5 }
  0x1b   : > { %s1433_s7 = scalar_select %p1139_p10, 1, 0 }
  0x1c   : > { %s1434_s8 = scalar_select %p1144_p12, 1, 0 }
  0x1d   : > { %p1149_p0 = pnand %p534_p11, %p156_p13  ;;  %s1024_s10 = smov [#allocation5]  }
  0x1e   : > { %1435 = sst [smem:[#allocation17_spill]] %s1434_s8  ;;  %s180_s11 = sshll.u32 %s1024_s10, 4  ;;  %s181_s11 = int_to_ptr.vmem [resolvable:$true] %s180_s11 }
  0x1f   : > { %s1436_s9 = scalar_select %p1149_p0, 1, 0 }
  0x20   : > { %p655_p1 = pneg %p1149_p0  ;;  %p676_p2 = scmp.lt.s32.totalorder %s1022_s25, 4 }
  0x21   : > { %s1439_s1 = sld [smem:[#allocation19_spill]] }
  0x22   : > { %p1158_p5 = pnand %p655_p1, %p1120_p3  ;;  %p1164_p7 = pnand %p676_p2, %p1125_p4 }
  0x24   : > { %s1438_s13 = scalar_select %p1164_p7, 1, 0 }
  0x25   : > { %p1176_p9 = pneg %p1158_p5 }
  0x27   : > { %s778_s26 = scalar_lea.hbm %s1439_s1, 256 }
  0x28   : > { %p779_p8 = scmp.ne.s32.totalorder %s1439_s1, %s778_s26  ;;  %p785_p13 = scmp.lt.u32.totalorder %s778_s26, %s1439_s1 }
  0x2a   : > { %p781_p11 = pnand %p1176_p9, %p779_p8 }
  0x2c   : > { %p782_p4 = pneg %p781_p11 }
  0x2e   : > { %p787_p1 = pnand %p785_p13, %p782_p4 }
  0x30   : > { %790 = shalt.err (!%p787_p1)
}
  0x31   : > { %s791_s14 = scalar_lea.vmem %s181_s11, 256  ;;  %p799_p6 = scmp.lt.s32.totalorder %s181_s11, %s181_s11 }
  0x32   : > { %p792_p2 = scmp.ne.s32.totalorder %s181_s11, %s791_s14  ;;  %p800_p3 = scmp.lt.s32.totalorder %s791_s14, %s791_s14 }
  0x34   : > { %p794_p12 = pnand %p792_p2, %p1176_p9  ;;  %p801_p0 = por %p800_p3, %p799_p6 }
  0x36   : > { %p795_p10 = pneg %p794_p12 }
  0x38   : > { %p802_p7 = pnand %p801_p0, %p795_p10 }
  0x3a   : > { %805 = shalt.err (!%p802_p7)
}
  0x3b   : > { %661 = dma.hbm_to_vmem [thread:$0]  (!%p1158_p5), %s1439_s1, 256, %s181_s11, [#allocation6]  }
  0x3c   : > { %s1025_s30 = smov [#allocation2]   ;;  %s1026_s10 = smov [#allocation7]  }
  0x3d   : > { %s169_s26 = sshll.u32 %s1025_s30, 4  ;;  %s191_s5 = sshll.u32 %s1026_s10, 4  ;;  %s170_s26 = int_to_ptr.vmem [resolvable:$true] %s169_s26  ;;  %s1192_s5 = int_to_ptr.vmem [resolvable:$true] %s191_s5 }
  0x3e   : > { %s1441_s0 = sld [smem:[#allocation18_spill]] }
  0x44   : > { %s806_s14 = scalar_lea.hbm %s1441_s0, 256 }
  0x45   : > { %p807_p3 = scmp.ne.s32.totalorder %s1441_s0, %s806_s14  ;;  %p813_p12 = scmp.lt.u32.totalorder %s806_s14, %s1441_s0 }
  0x47   : > { %p809_p6 = pnand %p807_p3, %p1176_p9 }
  0x49   : > { %p810_p10 = pneg %p809_p6 }
  0x4b   : > { %p815_p0 = pnand %p813_p12, %p810_p10 }
  0x4d   : > { %818 = shalt.err (!%p815_p0)
}
  0x4e   : > { %s819_s27 = scalar_lea.vmem %s170_s26, 256  ;;  %p827_p4 = scmp.lt.s32.totalorder %s170_s26, %s170_s26 }
  0x4f   : > { %p820_p7 = scmp.ne.s32.totalorder %s170_s26, %s819_s27  ;;  %p828_p13 = scmp.lt.s32.totalorder %s819_s27, %s819_s27 }
  0x51   : > { %p822_p8 = pnand %p820_p7, %p1176_p9  ;;  %p829_p1 = por %p828_p13, %p827_p4 }
  0x53   : > { %p823_p11 = pneg %p822_p8 }
  0x55   : > { %p830_p2 = pnand %p829_p1, %p823_p11 }
  0x57   : > { %833 = shalt.err (!%p830_p2)
}
  0x58   : > { %658 = dma.hbm_to_vmem [thread:$0]  (!%p1158_p5), %s1441_s0, 256, %s170_s26, [#allocation3]  }
  0x59   : > { %s1442_s2 = sld [smem:[#allocation20_spill]] }
  0x5f   : > { %s834_s30 = scalar_lea.hbm %s1442_s2, 256 }
  0x60   : > { %p835_p3 = scmp.ne.s32.totalorder %s1442_s2, %s834_s30  ;;  %p841_p12 = scmp.lt.u32.totalorder %s834_s30, %s1442_s2 }
  0x62   : > { %p837_p6 = pnand %p835_p3, %p1176_p9 }
  0x64   : > { %p838_p10 = pneg %p837_p6 }
  0x66   : > { %p843_p0 = pnand %p841_p12, %p838_p10 }
  0x68   : > { %846 = shalt.err (!%p843_p0)
}
  0x69   : > { %s847_s26 = scalar_lea.vmem %s1192_s5, 256  ;;  %p855_p4 = scmp.lt.s32.totalorder %s1192_s5, %s1192_s5 }
  0x6a   : > { %p848_p7 = scmp.ne.s32.totalorder %s1192_s5, %s847_s26  ;;  %p856_p13 = scmp.lt.s32.totalorder %s847_s26, %s847_s26 }
  0x6c   : > { %p850_p8 = pnand %p848_p7, %p1176_p9  ;;  %p857_p1 = por %p856_p13, %p855_p4 }
  0x6e   : > { %p851_p11 = pneg %p850_p8 }
  0x70   : > { %p858_p2 = pnand %p857_p1, %p851_p11 }
  0x72   : > { %861 = shalt.err (!%p858_p2)
}
  0x73   : > { %664 = dma.hbm_to_vmem [thread:$0]  (!%p1158_p5), %s1442_s2, 256, %s1192_s5, [#allocation6]  }
  0x74   : > { %s31_s28 = sadd.s32 1, %s1014_s23  ;;  %s34_s15 = sadd.s32 1, %s1018_s24 }
  0x75   : > { %p32_p9 = scmp.ge.s32.totalorder %s31_s28, 2  ;;  %s202_s25 = sand.u32 1, %s1002_s20  }
  0x76   : > { %s539_s8 = sshll.u32 %s202_s25, 7  ;;  %s562_s30 = sshll.u32 %s1014_s23, 5 }
  0x77   : > { %s1467_s28 = smov (%p32_p9, %s31_s28), 0  ;;  %s1469_s15 = smov (!%p32_p9, %s34_s15), %s1018_s24 }
  0x78   : > { %s101_s12 = ssub.s32 %s1014_s23, %s1467_s28  ;;  %p36_p3 = scmp.ge.s32.totalorder %s1469_s15, 2 }
  0x79   : > { %s212_s10 = sadd.s32 %s1018_s24, %s562_s30  ;;  %s206_s5 = scalar_lea.vmem [#allocation8], %s539_s8 }
  0x7a   : > { %s215_s14 = sshll.u32 %s206_s5, 4  ;;  %s1471_s15 = smov (%p36_p3, %s1469_s15), 0  ;;  %s1247_s14 = int_to_ptr.vmem [resolvable:$true] %s215_s14 }
  0x7b   : > { %s542_s18 = sshll.u32 %s212_s10, 7  ;;  %s102_s11 = ssub.s32 %s1018_s24, %s1471_s15 }
  0x7c   : > { %s1254_s4 = scalar_lea.hbm %s1411_s3, %s542_s18  ;;  %s103_s30 = sor.u32 %s102_s11, %s101_s12 }
  0x7d   : > { %p130_p5 = scmp.eq.s32.totalorder %s102_s11, 0  ;;  %p104_p6 = scmp.eq.s32.totalorder %s103_s30, 0 }
  0x7e   : > { %s1443_s8 = sadd.s32 1, %s990_s17  ;;  %s1444_s0 = sadd.s32 1, %s1002_s20 }
  0x7f   : > { %s1259_s5 = scalar_select %p130_p5, %s990_s17, %s1443_s8  }
  0x80   : > { %s1264_s10 = scalar_select %p104_p6, %s1002_s20, %s1444_s0  }
  0x81   : > { %s1266_s1 = scalar_lea.sflag [#allocation9], %s202_s25  ;;  %s862_s2 = scalar_lea.hbm %s1254_s4, 2048 }
  0x82   : > { %p863_p10 = scmp.ne.s32.totalorder %s1254_s4, %s862_s2  ;;  %p1445_p12 = scmp.ne.s32.totalorder %s1438_s13, 0 }
  0x83   : > { %s867_s11 = scalar_lea.hbm %s1411_s3, 8192  ;;  %p868_p11 = scmp.lt.u32.totalorder %s1254_s4, %s1411_s3 }
  0x84   : > { %p864_p0 = pneg %p1445_p12  ;;  %p869_p4 = scmp.lt.u32.totalorder %s867_s11, %s862_s2 }
  0x85   : > { %p871_p1 = scmp.lt.u32.totalorder %s862_s2, %s1254_s4 }
  0x86   : > { %p865_p7 = pnand %p864_p0, %p863_p10  ;;  %p870_p13 = por %p869_p4, %p868_p11 }
  0x88   : > { %p866_p8 = pneg %p865_p7  ;;  %p872_p2 = por %p871_p1, %p870_p13 }
  0x8a   : > { %p873_p9 = pnand %p872_p2, %p866_p8 }
  0x8c   : > { %876 = shalt.err (!%p873_p9)
}
  0x8d   : > { %s877_s0 = scalar_lea.vmem %s1247_s14, 2048  ;;  %s1027_s25 = smov [#allocation8]  }
  0x8e   : > { %p878_p3 = scmp.ne.s32.totalorder %s1247_s14, %s877_s0  ;;  %s882_s30 = sshll.u32 %s1027_s25, 4  ;;  %s883_s30 = int_to_ptr.vmem [resolvable:$false] %s882_s30 }
  0x8f   : > { %s884_s8 = scalar_lea.vmem %s883_s30, 4096  ;;  %p885_p10 = scmp.lt.s32.totalorder %s1247_s14, %s883_s30 }
  0x90   : > { %p880_p5 = pnand %p878_p3, %p864_p0  ;;  %p886_p7 = scmp.lt.s32.totalorder %s884_s8, %s877_s0 }
  0x92   : > { %p881_p6 = pneg %p880_p5  ;;  %p887_p11 = por %p886_p7, %p885_p10 }
  0x94   : > { %p888_p4 = pnand %p887_p11, %p881_p6 }
  0x96   : > { %891 = shalt.err (!%p888_p4)
}
  0x97   : > { %s1028_s2 = smov 256   ;;  %s1029_s18 = smov 128  }
  0x98   : > { %s1030_s12 = smov 8   ;;  %p1446_p0 = scmp.ne.s32.totalorder %s1436_s9, 0 }
  0x99   : > { %668 = dma.hbm_to_vmem [thread:$0]  (!%p1445_p12), %s1254_s4, 2048, %s1247_s14, %s1266_s1, %s1028_s2, %s1029_s18, %s1030_s12  }
  0x9a   : > { %227 = sbr.rel (%p1446_p0) target bundleno = 465 (0x1d1), region = 36  ;;  %p1447_p8 = scmp.ne.s32.totalorder (!%p1446_p0), %s1430_s29, 0 }
  0xa1   : > { %965 = dma.done.wait (%p1447_p8), [#allocation3], 256  }
  0xa2   : > { %967 = vsyncadd (%p1447_p8), [#allocation3], 4294967040 }
  0xa3   : > { %969 = dma.done.wait (%p1447_p8), [#allocation6], 512  }
  0xa4   : > { %971 = vsyncadd (%p1447_p8), [#allocation6], 4294966784  ;;  %s241_s11 = sand.u32 1, %s998_s19   ;;  %p1448_p12 = scmp.ne.s32.totalorder %s1432_s6, 0 }
  0xa5   : > { %s547_s13 = sshll.u32 %s241_s11, 7  ;;  %s242_s1 = scalar_lea.sflag [#allocation9], %s241_s11 }
  0xa6   : > { %s1305_s14 = scalar_lea.vmem [#allocation8], %s547_s13 }
  0xa7   : > { %973 = dma.done.wait (%p1448_p12), %s242_s1, 2048  }
  0xa8   : > { %975 = vsyncadd (%p1448_p12), %s242_s1, 4294965248  ;;  %s267_s29 = sand.u32 1, %s986_s16   ;;  %v1031_v0 = vmov 0.0|0.0   ;;  %vm1032_vm0 = vmmov 0   ;;  %v1033_v1 = vmov 0.0   ;;  %v277_v2 = vld [vmem:[%s1305_s14] sm:$0xff] }
  0xa9   : > { %s1314_s9 = sshll.u32 %s267_s29, 3  ;;  %615 = vmatprep.subr.bf16.mxu0 %v1031_v0  ;;  %612 = vmatprep.mubr.msk.f32.mxu0 %vm1032_vm0, %v1033_v1  ;;  %v278_v3 = vld [vmem:[%s1305_s14 + $0x8] sm:$0xff]  ;;  %v279_v4 = vld [vmem:[%s1305_s14 + $0x10] sm:$0xff]  ;;  %v280_v6 = vld [vmem:[%s1305_s14 + $0x18] sm:$0xff]  ;;  %s549_s6 = sshll.u32 %s1006_s21, 7 }
  0xaa   : > { %v616_v5 = vpack.c.bf16 %v278_v3, %v277_v2  ;;  %v619_v7 = vpack.c.bf16 %v280_v6, %v279_v4  ;;  %v281_v8 = vld [vmem:[%s1305_s14 + $0x20] sm:$0xff]  ;;  %v282_v9 = vld [vmem:[%s1305_s14 + $0x28] sm:$0xff]  ;;  %v283_v11 = vld [vmem:[%s1305_s14 + $0x30] sm:$0xff]  ;;  %s272_s4 = sshra.s32 %s549_s6, 7  ;;  %s1334_s0 = scalar_lea.vmem [#allocation10], %s1314_s9 }
  0xab   : > { %v622_v10 = vpack.c.bf16 %v282_v9, %v281_v8  ;;  %v284_v12 = vld [vmem:[%s1305_s14 + $0x38] sm:$0xff]  ;;  %v285_v14 = vld [vmem:[%s1305_s14 + $0x40] sm:$0xff]  ;;  %v286_v15 = vld [vmem:[%s1305_s14 + $0x48] sm:$0xff]  ;;  %s550_s26 = sshll.u32 %s272_s4, 3  ;;  %p551_p13 = scmp.ne.s32.totalorder %s1006_s21, 0 }
  0xac   : > { %617 = vmatpush3.bf16.msra.mxu0 %v616_v5  ;;  %v625_v13 = vpack.c.bf16 %v284_v12, %v283_v11  ;;  %v628_v16 = vpack.c.bf16 %v286_v15, %v285_v14  ;;  %v287_v17 = vld [vmem:[%s1305_s14 + $0x50] sm:$0xff]  ;;  %v288_v18 = vld [vmem:[%s1305_s14 + $0x58] sm:$0xff]  ;;  %v289_v20 = vld [vmem:[%s1305_s14 + $0x60] sm:$0xff]  ;;  %s275_s27 = scalar_lea.vmem [#allocation2], %s550_s26 }
  0xad   : > { %618 = vmatprep.subr.bf16.mxu0 %v1031_v0  ;;  %v631_v19 = vpack.c.bf16 %v288_v18, %v287_v17  ;;  %v290_v21 = vld [vmem:[%s1305_s14 + $0x68] sm:$0xff]  ;;  %v291_v23 = vld [vmem:[%s1305_s14 + $0x70] sm:$0xff]  ;;  %v292_v24 = vld [vmem:[%s1305_s14 + $0x78] sm:$0xff] }
  0xae   : > { %v634_v22 = vpack.c.bf16 %v290_v21, %v289_v20  ;;  %v637_v25 = vpack.c.bf16 %v292_v24, %v291_v23  ;;  %v276_v26 = vld [vmem:[%s275_s27] sm:$0xff] }
  0xb0   : > { %620 = vmatpush3.bf16.msra.mxu0 %v619_v7 }
  0xb1   : > { %621 = vmatprep.subr.bf16.mxu0 %v1031_v0 }
  0xb4   : > { %623 = vmatpush3.bf16.msra.mxu0 %v622_v10 }
  0xb5   : > { %624 = vmatprep.subr.bf16.mxu0 %v1031_v0 }
  0xb8   : > { %626 = vmatpush3.bf16.msra.mxu0 %v625_v13 }
  0xb9   : > { %627 = vmatprep.subr.bf16.mxu0 %v1031_v0 }
  0xbc   : > { %629 = vmatpush3.bf16.msra.mxu0 %v628_v16 }
  0xbd   : > { %630 = vmatprep.subr.bf16.mxu0 %v1031_v0 }
  0xc0   : > { %632 = vmatpush3.bf16.msra.mxu0 %v631_v19 }
  0xc1   : > { %633 = vmatprep.subr.bf16.mxu0 %v1031_v0 }
  0xc4   : > { %635 = vmatpush3.bf16.msra.mxu0 %v634_v22 }
  0xc5   : > { %636 = vmatprep.subr.bf16.mxu0 %v1031_v0 }
  0xc8   : > { %638 = vmatpush3.bf16.msra.mxu0 %v637_v25 }
  0xcb   : > { %613 = vmatmul.mubr.f32.vlgmr.msra.gmra.mrb[0].mxu0 %v276_v26 }
 0x199   : > { %366 = sbr.rel (%p551_p13) target bundleno = 416 (0x1a0), region = 56 }
 0x19e   : > { %v359_v27 = vpop.f32.mrb[0].mxu0 }
 0x19f   : > { %v614_v28 = vpop.f32.mrb[1].mxu0  ;;  %367 = vst [vmem:[%s1334_s0] sm:$0xff] (!%p551_p13), %v359_v27 }
 0x1a0 PF: > { %p552_p1 = scmp.le.s32.totalorder %s1006_s21, 0 }
 0x1a2   : > { %371 = sbr.rel (%p552_p1) target bundleno = 426 (0x1aa), region = 60 }
 0x1a6   : > { %v372_v29 = vld [vmem:[%s1334_s0] sm:$0xff] (!%p552_p1) }
 0x1a7   : > { %v373_v30 = vadd.f32 (!%p552_p1), %v372_v29, %v359_v27 }
 0x1a9   : > { %374 = vst [vmem:[%s1334_s0] sm:$0xff] %v373_v30 }
 0x1aa PF: > { %p553_p2 = scmp.ne.s32.totalorder %s1006_s21, 1 }
 0x1ab   : > { %s554_s25 = sshll.u32 (!%p553_p2), %s1010_s22, 7 }
 0x1ac   : > { %378 = sbr.rel (%p553_p2) target bundleno = 439 (0x1b7), region = 64  ;;  %s380_s30 = sshra.s32 (!%p553_p2), %s554_s25, 7 }
 0x1ad   : > { %s555_s8 = sshll.u32 (!%p553_p2), %s380_s30, 3 }
 0x1ae   : > { %s383_s2 = scalar_lea.vmem (!%p553_p2), [#allocation2], %s555_s8  ;;  %s386_s18 = scalar_lea.vmem (!%p553_p2), [#allocation5], %s555_s8 }
 0x1af   : > { %v384_v32 = vld [vmem:[%s383_s2] sm:$0xff] (!%p553_p2)  ;;  %s391_s12 = scalar_lea.vmem (!%p553_p2), [#allocation7], %s555_s8 }
 0x1b0   : > { %v389_v31 = vld [vmem:[%s1334_s0] sm:$0xff] (!%p553_p2)  ;;  %v387_v33 = vld [vmem:[%s386_s18] sm:$0xff] (!%p553_p2) }
 0x1b1   : > { %v388_v34 = vmul.f32 (!%p553_p2), %v387_v33, %v384_v32  ;;  %v392_v35 = vld [vmem:[%s391_s12] sm:$0xff] (!%p553_p2) }
 0x1b2   : > { %v393_v36 = vmul.f32 (!%p553_p2), %v392_v35, %v389_v31 }
 0x1b4   : > { %v394_v37 = vadd.f32 %v393_v36, %v388_v34 }
 0x1b6   : > { %395 = vst [vmem:[%s1334_s0] sm:$0xff] %v394_v37 }
 0x1b7 PF: > { %s559_s21 = sshll.u32 %s1010_s22, 7  ;;  %s1449_s1 = sld [smem:[#allocation21_spill]] }
 0x1b8   : > { %s410_s9 = sshll.u32 %s1334_s0, 4  ;;  %s397_s6 = scalar_lea.sflag [#allocation4], %s267_s29  ;;  %s411_s9 = int_to_ptr.vmem [resolvable:$true] %s410_s9 }
 0x1b9   : > { %s892_s4 = scalar_lea.vmem %s411_s9, 128  ;;  %p1450_p3 = scmp.ne.s32.totalorder %s1433_s7, 0 }
 0x1ba   : > { %p893_p9 = scmp.ne.s32.totalorder %s411_s9, %s892_s4  ;;  %s1034_s26 = smov [#allocation10]  }
 0x1bb   : > { %s896_s27 = sshll.u32 %s1034_s26, 4  ;;  %s897_s27 = int_to_ptr.vmem [resolvable:$false] %s896_s27 }
 0x1bc   : > { %p894_p5 = pnand %p893_p9, %p1450_p3  ;;  %s898_s25 = scalar_lea.vmem %s897_s27, 256 }
 0x1bd   : > { %s1349_s14 = scalar_lea.hbm %s1449_s1, %s559_s21  ;;  %p899_p10 = scmp.lt.s32.totalorder %s411_s9, %s897_s27 }
 0x1be   : > { %p895_p6 = pneg %p894_p5  ;;  %p900_p7 = scmp.lt.s32.totalorder %s898_s25, %s892_s4 }
 0x1c0   : > { %p901_p11 = por %p900_p7, %p899_p10 }
 0x1c2   : > { %p902_p4 = pnand %p901_p11, %p895_p6 }
 0x1c4   : > { %905 = shalt.err (!%p902_p4)
}
 0x1c5   : > { %s906_s22 = scalar_lea.hbm %s1349_s14, 128  ;;  %s910_s30 = scalar_lea.hbm %s1449_s1, 256 }
 0x1c6   : > { %p907_p0 = scmp.ne.s32.totalorder %s1349_s14, %s906_s22  ;;  %p911_p13 = scmp.lt.u32.totalorder %s1349_s14, %s1449_s1 }
 0x1c7   : > { %p912_p1 = scmp.lt.u32.totalorder %s910_s30, %s906_s22  ;;  %p914_p9 = scmp.lt.u32.totalorder %s906_s22, %s1349_s14 }
 0x1c8   : > { %p908_p8 = pnand %p907_p0, %p1450_p3 }
 0x1c9   : > { %p913_p2 = por %p912_p1, %p911_p13 }
 0x1ca   : > { %p909_p12 = pneg %p908_p8 }
 0x1cb   : > { %p915_p5 = por %p914_p9, %p913_p2 }
 0x1cd   : > { %p916_p6 = pnand %p915_p5, %p909_p12 }
 0x1cf   : > { %919 = shalt.err (!%p916_p6)
}
 0x1d0   : > { %653 = dma.vmem_to_hbm [thread:$0]  (%p1450_p3), %s411_s9, 128, %s1349_s14, %s397_s6  }
 0x1d1 PF: > { %s1451_s18 = sld [smem:[#allocation16_spill]]  ;;  %s1452_s12 = sld [smem:[#allocation15_spill]] }
 0x1d2   : > { %s1453_s21 = sld [smem:[#allocation17_spill]] }
 0x1d7   : > { %p680_p10 = scmp.ge.s32.totalorder %s1451_s18, 2  ;;  %s422_s11 = sand.u32 1, %s1452_s12  }
 0x1d8   : > { %p1454_p7 = scmp.ne.s32.totalorder %s1453_s21, 0  ;;  %s423_s13 = scalar_lea.sflag [#allocation4], %s422_s11 }
 0x1da   : > { %p670_p11 = pnand %p680_p10, %p1454_p7 }
 0x1dc   : > { %977 = dma.done.wait (!%p670_p11), %s423_s13, 128  }
 0x1dd   : > { %979 = vsyncadd (!%p670_p11), %s423_s13, 4294967168  ;;  %s22_s25 = sadd.s32 1, %s1451_s18   ;;  %s1455_s7 = smov %s1471_s15 }
 0x1de   : > { %p19_p4 = scmp.ge.s32.totalorder %s22_s25, 6   ;;  %s1456_s15 = smov %s986_s16 }
 0x1df   : > { %s1457_s16 = smov %s990_s17  ;;  %s1458_s17 = smov %s1259_s5 }
 0x1e0   : > { %s1459_s18 = smov %s998_s19  ;;  %s1460_s19 = smov %s1002_s20 }
 0x1e1   : > { %s1461_s20 = smov %s1264_s10  ;;  %s1462_s21 = smov %s1014_s23 }
 0x1e2   : > { %s1463_s22 = smov %s1018_s24  ;;  %s1464_s23 = smov %s1467_s28 }
 0x1e3   : > { %s1465_s24 = smov %s1455_s7  ;;  %21 = sbr.rel (!%p19_p4) target bundleno = 16 (0x10), region = 110 }
 0x1ea   :  { %428 = vsyncpa [#allocation3], 1 }
 0x1eb   :  { %430 = vsyncpa [#allocation3 + $0x1], 1 }
 0x1ec   :  { %431 = vsyncpa [#allocation6], 1 }
 0x1ed   :  { %432 = vsyncpa [#allocation9], 1 }
 0x1ee   :  { %434 = vsyncpa [#allocation9 + $0x1], 1 }
 0x1ef   :  { %435 = vsyncpa [#allocation4], 1 }
 0x1f0   :  { %437 = vsyncpa [#allocation4 + $0x1], 1 }

</bundles_post_ra>
